<compile_context>
chip_gen: v5e
topology: v5e:2x2
jax: 0.10.0
libtpu: 0.0.40
codegen_flags: <defaults>
</compile_context>

<pallas_src>
import jax
import jax.numpy as jnp
from jax.experimental import pallas as pl
from jax.experimental.pallas import tpu as pltpu


def _round_up(x, m):
    return ((x + m - 1) // m) * m


def _linear_kernel(x_ref, w_ref, b_ref, o_ref):
    # x_ref: [tm, c_in], w_ref: [c_in, d_model], b_ref: [1, d_model] (f32),
    # o_ref: [tm, d_model]
    acc = jnp.dot(x_ref[...], w_ref[...], preferred_element_type=jnp.float32)
    o_ref[...] = (acc + b_ref[...]).astype(o_ref.dtype)


def prepare_data_embedding_params(weight, bias):
    """Hoisted one-time prep (module-init analogue).

    weight: [d_model, c_in] (PyTorch nn.Linear layout); bias: [d_model].
    Returns (w_t, b2d) in kernel layout: [c_in, d_model], [1, d_model] f32.
    """
    w_t = weight.T
    b2d = bias.reshape(1, -1).astype(jnp.float32)
    return w_t, b2d


def _pick_row_tile(rows, d_model, out_itemsize):
    """Row tile giving ~3 MiB output slab, sublane-aligned, >= 8 grid steps."""
    sublane = 8 if out_itemsize >= 4 else (16 if out_itemsize == 2 else 32)
    target_out_bytes = 3 << 20                      # ~3 MiB output slab / step
    tm = target_out_bytes // max(1, d_model * out_itemsize)
    tm = max(512, min(4096, tm))
    tm = _round_up(tm, sublane)
    # Keep >= 8 grid steps (>= 4 per core on v7x) so pipelining has overlap.
    min_steps = 8
    if rows >= min_steps * sublane:
        tm = min(tm, _round_up(pl.cdiv(rows, min_steps), sublane))
    if rows <= tm:
        tm = rows                                   # single full-extent tile
    return tm, sublane


def data_embedding_forward_prepared(x, w_t, b2d, *, tile_rows=None):
    """x: [batch, seq, c_in]; w_t: [c_in, d_model]; b2d: [1, d_model] f32."""
    batch, seq, c_in = x.shape
    d_model = w_t.shape[1]
    rows = batch * seq
    x2d = x.reshape(rows, c_in)

    x_it = jnp.dtype(x.dtype).itemsize
    w_it = jnp.dtype(w_t.dtype).itemsize
    out_it = x_it

    if tile_rows is None:
        tm, sublane = _pick_row_tile(rows, d_model, out_it)
    else:
        sublane = 8 if out_it >= 4 else (16 if out_it == 2 else 32)
        tm = min(tile_rows, rows)
        if tm < rows:
            tm = _round_up(tm, sublane)

    # Lane/sublane-padded VMEM footprint (what Mosaic actually allocates):
    # x tile pads c_in -> 128 lanes, W pads c_in -> 8 sublanes, bias pads
    # 1 -> 8 sublanes, out pads d_model -> multiple of 128 lanes.
    lane = 128
    dml = _round_up(d_model, lane)
    w_buf = _round_up(c_in, 8) * dml * w_it
    b_buf = 8 * dml * 4

    def footprint(tm_):
        x_buf = tm_ * _round_up(c_in, lane) * x_it
        o_buf = tm_ * dml * out_it
        return 2 * (x_buf + o_buf + w_buf + b_buf)  # double-buffered bound

    vmem_bytes = footprint(tm)

    try:
        vmem_cap = pltpu.get_tpu_info().vmem_capacity_bytes
    except Exception:
        vmem_cap = 64 << 20                         # conservative (v7x per-TC)
    ceiling = int(vmem_cap * 3 // 4)                # headroom for compiler scratch

    # Shrink tm if the padded footprint would blow the generation ceiling.
    while vmem_bytes + (8 << 20) > ceiling and tm > sublane:
        tm = max(_round_up(tm // 2, sublane), sublane)
        vmem_bytes = footprint(tm)

    vmem_limit = int(min(max(vmem_bytes + (8 << 20), 32 << 20), ceiling))

    grid = (pl.cdiv(rows, tm),)

    cost = pl.CostEstimate(
        flops=2 * rows * c_in * d_model,
        transcendentals=0,
        bytes_accessed=(rows * c_in * x_it           # read x
                        + rows * d_model * out_it    # write out
                        + c_in * d_model * w_it      # W (read once)
                        + d_model * 4),              # bias (f32, once)
    )

    out2d = pl.pallas_call(
        _linear_kernel,
        out_shape=jax.ShapeDtypeStruct((rows, d_model), x.dtype),
        grid=grid,
        in_specs=[
            pl.BlockSpec((tm, c_in), lambda i: (i, 0)),       # row-tiled x
            pl.BlockSpec((c_in, d_model), lambda i: (0, 0)),  # W resident
            pl.BlockSpec((1, d_model), lambda i: (0, 0)),     # bias resident
        ],
        out_specs=pl.BlockSpec((tm, d_model), lambda i: (i, 0)),
        compiler_params=pltpu.CompilerParams(
            # Row axis is embarrassingly parallel; lets v7x shard grid steps
            # across both TensorCores (no-op on single-TC v5e/v6e).
            # TODO(synk): explicit pl.core_map / CORE_PARALLEL sharding on v7x.
            dimension_semantics=("parallel",),
            vmem_limit_bytes=vmem_limit,
        ),
        cost_estimate=cost,
    )(x2d, w_t, b2d)

    # Dropout in eval mode == identity.
    return out2d.reshape(batch, seq, d_model)


def data_embedding_forward(x, weight, bias, *, tile_rows=None):
    """Convenience wrapper taking PyTorch-layout params. In a real model,
    prepare_data_embedding_params() should be hoisted to module init."""
    w_t, b2d = prepare_data_embedding_params(weight, bias)
    return data_embedding_forward_prepared(x, w_t, b2d, tile_rows=tile_rows)


if __name__ == "__main__":
    key = jax.random.PRNGKey(0)
    k_x, k_w, k_b, k_x2, k_w2, k_b2 = jax.random.split(key, 6)

    # --- Small case matching the module spec: batch=2, seq=8, c_in=4, d_model=32
    batch, seq, c_in, d_model = 2, 8, 4, 32
    bound = 1.0 / (c_in ** 0.5)
    weight = jax.random.uniform(k_w, (d_model, c_in), jnp.float32, -bound, bound)
    bias = jax.random.uniform(k_b, (d_model,), jnp.float32, -bound, bound)
    x = jax.random.normal(k_x, (batch, seq, c_in), jnp.float32)

    w_t, b2d = prepare_data_embedding_params(weight, bias)   # hoisted once
    out = data_embedding_forward_prepared(x, w_t, b2d)
    out = jax.block_until_ready(out)

    ref = x @ weight.T + bias
    assert out.shape == (batch, seq, d_model)
    assert jnp.allclose(out, ref, atol=1e-5, rtol=1e-5)

    # --- Moderate case exercising the multi-step tiled path, partial last row
    #     tile, and non-128-aligned d_model (masked in-kernel stores).
    b2_, s2_, c2_, d2_ = 3, 700, 7, 96
    bound2 = 1.0 / (c2_ ** 0.5)
    weight2 = jax.random.uniform(k_w2, (d2_, c2_), jnp.float32, -bound2, bound2)
    bias2 = jax.random.uniform(k_b2, (d2_,), jnp.float32, -bound2, bound2)
    x2 = jax.random.normal(k_x2, (b2_, s2_, c2_), jnp.float32)

    out2 = jax.block_until_ready(data_embedding_forward(x2, weight2, bias2))
    ref2 = x2 @ weight2.T + bias2
    assert out2.shape == (b2_, s2_, d2_)
    assert jnp.allclose(out2, ref2, atol=1e-3, rtol=1e-3)

    print("KERNEL_OK")
</pallas_src>

<mosaic_0001>
module attributes {stable_mosaic.version = 11 : i64} {
  func.func @_linear_kernel(%arg0: i32, %arg1: memref<16x4xf32, #tpu.memory_space<vmem>>, %arg2: memref<4x32xf32, #tpu.memory_space<vmem>>, %arg3: memref<1x32xf32, #tpu.memory_space<vmem>>, %arg4: memref<16x32xf32, #tpu.memory_space<vmem>>) attributes {dimension_semantics = [#tpu.dimension_semantics<parallel>], iteration_bounds = array<i64: 1>, scalar_prefetch = 0 : i64, scratch_operands = 0 : i64, tpu.core_type = #tpu.core_type<tc>, window_params = [{transform_indices = @transform_0, window_bounds = array<i64: 16, 4>}, {pipeline_mode = #tpu.pipeline_mode<synchronous>, transform_indices = @transform_1, window_bounds = array<i64: 4, 32>}, {pipeline_mode = #tpu.pipeline_mode<synchronous>, transform_indices = @transform_2, window_bounds = array<i64: 1, 32>}, {transform_indices = @transform_3, window_bounds = array<i64: 16, 32>}]} {
    %c0 = arith.constant 0 : index
    %c0_0 = arith.constant 0 : index
    %0 = vector.load %arg1[%c0, %c0_0] : memref<16x4xf32, #tpu.memory_space<vmem>>, vector<16x4xf32>
    %c0_1 = arith.constant 0 : index
    %c0_2 = arith.constant 0 : index
    %1 = vector.load %arg2[%c0_1, %c0_2] : memref<4x32xf32, #tpu.memory_space<vmem>>, vector<4x32xf32>
    %cst = arith.constant dense<0.000000e+00> : vector<16x32xf32>
    %2 = tpu.matmul %0, %1, %cst {dimension_numbers = #tpu.dot_dimension_numbers<[1], [0], [0], [1], [0, 0, 1, 1], [], []>} : vector<16x4xf32>, vector<4x32xf32>, vector<16x32xf32> -> vector<16x32xf32>
    %c0_3 = arith.constant 0 : index
    %c0_4 = arith.constant 0 : index
    %3 = vector.load %arg3[%c0_3, %c0_4] : memref<1x32xf32, #tpu.memory_space<vmem>>, vector<1x32xf32>
    %4 = vector.broadcast %3 : vector<1x32xf32> to vector<16x32xf32>
    %5 = arith.addf %2, %4 : vector<16x32xf32>
    %c0_5 = arith.constant 0 : index
    %c0_6 = arith.constant 0 : index
    %6 = vector.load %arg4[%c0_5, %c0_6] : memref<16x32xf32, #tpu.memory_space<vmem>>, vector<16x32xf32>
    tpu.vector_store %arg4[%c0_5, %c0_6], %5 {strides = array<i32>} : memref<16x32xf32, #tpu.memory_space<vmem>>, vector<16x32xf32>,
    return
  }
  func.func @transform_0(%arg0: i32) -> (i32, i32) {
    %c0_i32 = arith.constant 0 : i32
    %c0_i32_0 = arith.constant 0 : i32
    return %arg0, %c0_i32 : i32, i32
  }
  func.func @transform_1(%arg0: i32) -> (i32, i32) {
    %c0_i32 = arith.constant 0 : i32
    %c0_i32_0 = arith.constant 0 : i32
    %c0_i32_1 = arith.constant 0 : i32
    return %c0_i32, %c0_i32_0 : i32, i32
  }
  func.func @transform_2(%arg0: i32) -> (i32, i32) {
    %c0_i32 = arith.constant 0 : i32
    %c0_i32_0 = arith.constant 0 : i32
    %c0_i32_1 = arith.constant 0 : i32
    return %c0_i32, %c0_i32_0 : i32, i32
  }
  func.func @transform_3(%arg0: i32) -> (i32, i32) {
    %c0_i32 = arith.constant 0 : i32
    %c0_i32_0 = arith.constant 0 : i32
    return %arg0, %c0_i32 : i32, i32
  }
}

</mosaic_0001>

<bundles_post_ra>
// kernel: tpu_custom_call.1
= control target key start
LH: loop header
LB: loop body
LE: loop exit
PB: predicated region body
PF: predicated region fallthrough
CT: control target
= control target key end

     0   :  { %vm29_vm0 = vcmask 1043456   ;;  %vm22_vm1 = vcmask 31744   ;;  %s149_s0 = inlined_call_operand.vmem [shape: f32[16,4], index: 0, kind: input, shape index: {}]   ;;  %s150_s1 = inlined_call_operand.vmem [shape: f32[4,32], index: 1, kind: input, shape index: {}]   ;;  %s151_s2 = inlined_call_operand.vmem [shape: f32[1,32], index: 2, kind: input, shape index: {}]   ;;  %s152_s3 = inlined_call_operand.hbm [shape: f32[16,32], index: 3, kind: output, shape index: {}]  }
   0x1   :  { %v17_v0 = vld [vmem:[%s150_s1] sm:$0xf]  ;;  %v16_v2 = vld [vmem:[%s149_s0 + $0x8] sm:$0xff] }
   0x2   :  { %v15_v1 = vld [vmem:[%s149_s0] sm:$0xff]  ;;  %77 = vmatpush.msk.msra.mxu0 %vm29_vm0, %v17_v0  ;;  %80 = vmatpush.msk.msra.mxu1 %vm29_vm0, %v17_v0 }
   0x3   :  { %8 = vsyncpa [#allocation3], 0  ;;  %78 = vmatmul.msk.f32.vlgmr.msra.gmra.mxu0 %vm22_vm1, %v15_v1  ;;  %79 = vmatmul.msk.f32.vlgmr.msra.gmra.mxu1 %vm22_vm1, %v16_v2  ;;  %v84_v3 = vld [vmem:[%s151_s2] ss:$0 sm:$0xff]  ;;  %s111_s1 = smov [#allocation2]   ;;  %s65_s23 = sshll.u32 %s152_s3, 4  ;;  %s66_s23 = int_to_ptr.hbm [resolvable:$true] %s65_s23 }
   0x4   :  { %s63_s20 = sshll.u32 %s111_s1, 4  ;;  %vm56_vm2 = vcmask 261120   ;;  %s112_s0 = smov 128   ;;  %s64_s20 = int_to_ptr.vmem [resolvable:$true] %s63_s20 }
   0x5   :  { %s113_s24 = smov 8  }
  0x80   :  { %v50_v4 = vpop.f32.mrf.mxu0  ;;  %v53_v5 = vpop.f32.mrf.mxu1 }
  0x81   :  { %v51_v6 = vadd.f32 %v84_v3, %v50_v4  ;;  %v54_v7 = vadd.f32 %v84_v3, %v53_v5 }
  0x83   :  { %57 = vst.msk [vmem:[#allocation2] sm:$0xff] %vm56_vm2, %v51_v6 }
  0x84   :  { %58 = vst.msk [vmem:[#allocation2 + $0x8] sm:$0xff] %vm56_vm2, %v54_v7 }
  0x85   :  { %71 = dma.vmem_to_hbm [thread:$0]  %s64_s20, 256, %s66_s23, [#allocation3], %s112_s0, %s112_s0, %s113_s24  }
  0x86   :  { %109 = dma.done.wait [#allocation3], 256  }
  0x87   :  { %110 = vsyncadd [#allocation3], 4294967040 }
  0x88   :  { %76 = vsyncpa [#allocation3], 1 }

</bundles_post_ra>
